<compile_context>
chip_gen: v6e
topology: v6e:2x2x1
jax: 0.10.0
libtpu: 0.0.40
codegen_flags: <defaults>
</compile_context>

<pallas_src>
import functools

import jax
import jax.numpy as jnp
from jax.experimental import pallas as pl
from jax.experimental.pallas import tpu as pltpu


def _layernorm_kernel(x_ref, scale_ref, shift_ref, o_ref, *, eps):
    # x_ref:     (block_rows, D) VMEM tile (input dtype)
    # scale_ref: (1, D) float32  (pre-cast in wrapper, resident across grid steps)
    # shift_ref: (1, D) float32
    x = x_ref[...].astype(jnp.float32)                            # f32 math
    mean = jnp.mean(x, axis=-1, keepdims=True)
    centered = x - mean
    var = jnp.mean(centered * centered, axis=-1, keepdims=True)   # unbiased=False
    inv = jax.lax.rsqrt(var + eps)
    out = scale_ref[...] * (centered * inv) + shift_ref[...]
    o_ref[...] = out.astype(o_ref.dtype)


def _round_up(n, m):
    return ((n + m - 1) // m) * m


def _vmem_capacity_bytes():
    """Generation-aware VMEM size (v5e/v6e: 128 MiB, v7x: 64 MiB per TC)."""
    try:
        info = pltpu.get_tpu_info()
        cap = getattr(info, "vmem_capacity_bytes", None)
        if cap:
            return int(cap)
    except Exception:
        pass
    return 64 * 1024 * 1024  # conservative fallback (v7x-sized VMEM)


def layer_norm(x, scale, shift, *, eps=1e-5, tile_bytes_target=None):
    """x: (..., D); scale/shift: (D,). torch.nn-style LayerNorm semantics."""
    orig_shape = x.shape
    D = orig_shape[-1]
    x2 = x.reshape(-1, D)
    R = x2.shape[0]

    itemsize = jnp.dtype(x.dtype).itemsize
    # Sublane packing: f32 -> 8 rows, bf16/f16 -> 16, int8/fp8 -> 32.
    row_align = {4: 8, 2: 16, 1: 32}.get(itemsize, 8)

    vmem_cap = _vmem_capacity_bytes()
    # Leave headroom below physical VMEM for Mosaic internal scratch:
    # ~48 MiB cap on v7x (64 MiB parts), ~96 MiB on v5e/v6e (128 MiB parts).
    vmem_cap_limit = (vmem_cap * 3) // 4
    if tile_bytes_target is None:
        # ~4 MiB input tiles on v7x, ~8 MiB on v5e/v6e: large enough that the
        # ~0.35 us fixed per-grid-step overhead is a few % of DMA step time.
        tile_bytes_target = vmem_cap // 16

    row_bytes = D * itemsize
    if R <= row_align:
        # Tiny input: a single full-array block (always layout-legal even if
        # R is not a multiple of the sublane alignment).
        block_rows = R
    else:
        # VMEM-budgeted rows per tile.
        rows_budget = max(row_align,
                          (tile_bytes_target // row_bytes) // row_align * row_align)
        # Keep >= 4 blocks when R allows it so the pipeline overlaps
        # read/compute/write-back and v7x's two TensorCores both get rows.
        rows_4blocks = max(row_align, _round_up(pl.cdiv(R, 4), row_align))
        block_rows = min(rows_budget, rows_4blocks)
    grid = pl.cdiv(R, block_rows)

    # Cast params once; constant index_map keeps them VMEM-resident.
    scale2 = scale.astype(jnp.float32).reshape(1, D)
    shift2 = shift.astype(jnp.float32).reshape(1, D)

    # Single conservative VMEM estimate (+25% headroom, no double hedge):
    # double-buffered input + output blocks, ~3 live f32 temporaries
    # (upcast / centered / result), plus resident scale & shift.
    in_block = block_rows * D * itemsize
    out_block = in_block
    f32_block = block_rows * D * 4
    footprint = 2 * in_block + 2 * out_block + 3 * f32_block + 2 * D * 4
    vmem_limit = int(min(vmem_cap_limit,
                         max((footprint * 5) // 4, 16 * 1024 * 1024)))

    out = pl.pallas_call(
        functools.partial(_layernorm_kernel, eps=eps),
        out_shape=jax.ShapeDtypeStruct((R, D), x.dtype),
        grid_spec=pltpu.PrefetchScalarGridSpec(
            num_scalar_prefetch=0,
            grid=(grid,),
            in_specs=[
                pl.BlockSpec((block_rows, D), lambda i: (i, 0)),
                pl.BlockSpec((1, D), lambda i: (0, 0)),
                pl.BlockSpec((1, D), lambda i: (0, 0)),
            ],
            out_specs=pl.BlockSpec((block_rows, D), lambda i: (i, 0)),
        ),
        compiler_params=pltpu.CompilerParams(
            dimension_semantics=("parallel",),   # rows shard across TCs on v7x
            vmem_limit_bytes=vmem_limit,
        ),
    )(x2, scale2, shift2)

    return out.reshape(orig_shape)


def _reference(x, scale, shift, eps=1e-5):
    x32 = x.astype(jnp.float32)
    mean = jnp.mean(x32, axis=-1, keepdims=True)
    var = jnp.mean((x32 - mean) ** 2, axis=-1, keepdims=True)
    ref = scale * ((x32 - mean) / jnp.sqrt(var + eps)) + shift
    return ref.astype(x.dtype)


if __name__ == "__main__":
    key = jax.random.PRNGKey(0)

    # Shape consistent with the module's forward: (batch, seq, emb_dim) = (2, 4, 768).
    emb_dim = 768
    x = jax.random.normal(key, (2, 4, emb_dim), dtype=jnp.float32)

    # Deterministic parameter init per LayerNorm.__init__: ones / zeros.
    scale = jnp.ones((emb_dim,), dtype=jnp.float32)
    shift = jnp.zeros((emb_dim,), dtype=jnp.float32)

    out = layer_norm(x, scale, shift, eps=1e-5)
    out = jax.block_until_ready(out)
    ref = _reference(x, scale, shift, eps=1e-5)
    assert jnp.allclose(out, ref, atol=1e-5, rtol=1e-5), "mismatch vs reference (small)"

    # Second check: multi-tile path with a ragged final block and non-trivial
    # scale/shift (R = 2100 rows -> 4 blocks of 528 rows, last block partial).
    key2 = jax.random.PRNGKey(1)
    emb2 = 256
    x2 = jax.random.normal(key2, (3, 700, emb2), dtype=jnp.float32)
    scale2 = jax.random.normal(jax.random.PRNGKey(2), (emb2,), dtype=jnp.float32)
    shift2 = jax.random.normal(jax.random.PRNGKey(3), (emb2,), dtype=jnp.float32)

    out2 = layer_norm(x2, scale2, shift2, eps=1e-5)
    out2 = jax.block_until_ready(out2)
    ref2 = _reference(x2, scale2, shift2, eps=1e-5)
    assert jnp.allclose(out2, ref2, atol=1e-4, rtol=1e-4), "mismatch vs reference (tiled)"

    # Third check: bf16 I/O exercises the 16-row sublane alignment path.
    x3 = jax.random.normal(jax.random.PRNGKey(4), (4, 300, emb2), dtype=jnp.bfloat16)
    out3 = jax.block_until_ready(layer_norm(x3, scale2, shift2, eps=1e-5))
    ref3 = _reference(x3, scale2, shift2, eps=1e-5)
    assert jnp.allclose(out3.astype(jnp.float32), ref3.astype(jnp.float32),
                        atol=3e-2, rtol=3e-2), "mismatch vs reference (bf16)"

    print("KERNEL_OK")
</pallas_src>

<mosaic_0001>
module attributes {stable_mosaic.version = 11 : i64} {
  func.func @_layernorm_kernel(%arg0: i32, %arg1: memref<8x768xf32, #tpu.memory_space<vmem>>, %arg2: memref<1x768xf32, #tpu.memory_space<vmem>>, %arg3: memref<1x768xf32, #tpu.memory_space<vmem>>, %arg4: memref<8x768xf32, #tpu.memory_space<vmem>>) attributes {dimension_semantics = [#tpu.dimension_semantics<parallel>], iteration_bounds = array<i64: 1>, scalar_prefetch = 0 : i64, scratch_operands = 0 : i64, tpu.core_type = #tpu.core_type<tc>, window_params = [{transform_indices = @transform_0, window_bounds = array<i64: 8, 768>}, {pipeline_mode = #tpu.pipeline_mode<synchronous>, transform_indices = @transform_1, window_bounds = array<i64: 1, 768>}, {pipeline_mode = #tpu.pipeline_mode<synchronous>, transform_indices = @transform_2, window_bounds = array<i64: 1, 768>}, {transform_indices = @transform_3, window_bounds = array<i64: 8, 768>}]} {
    %c0 = arith.constant 0 : index
    %c0_0 = arith.constant 0 : index
    %0 = vector.load %arg1[%c0, %c0_0] : memref<8x768xf32, #tpu.memory_space<vmem>>, vector<8x768xf32>
    %cst = arith.constant dense<0.000000e+00> : vector<8xf32>
    %1 = vector.multi_reduction <add>, %0, %cst [1] : vector<8x768xf32> to vector<8xf32>
    %2 = vector.shape_cast %1 : vector<8xf32> to vector<8x1xf32>
    %cst_1 = arith.constant 7.680000e+02 : f32
    %3 = vector.broadcast %cst_1 : f32 to vector<8x1xf32>
    %4 = arith.divf %2, %3 : vector<8x1xf32>
    %5 = vector.broadcast %4 : vector<8x1xf32> to vector<8x768xf32>
    %6 = arith.subf %0, %5 : vector<8x768xf32>
    %7 = arith.mulf %6, %6 : vector<8x768xf32>
    %cst_2 = arith.constant dense<0.000000e+00> : vector<8xf32>
    %8 = vector.multi_reduction <add>, %7, %cst_2 [1] : vector<8x768xf32> to vector<8xf32>
    %9 = vector.shape_cast %8 : vector<8xf32> to vector<8x1xf32>
    %cst_3 = arith.constant 7.680000e+02 : f32
    %10 = vector.broadcast %cst_3 : f32 to vector<8x1xf32>
    %11 = arith.divf %9, %10 : vector<8x1xf32>
    %cst_4 = arith.constant 9.99999974E-6 : f32
    %12 = vector.broadcast %cst_4 : f32 to vector<8x1xf32>
    %13 = arith.addf %11, %12 : vector<8x1xf32>
    %14 = math.rsqrt %13 : vector<8x1xf32>
    %c0_5 = arith.constant 0 : index
    %c0_6 = arith.constant 0 : index
    %15 = vector.load %arg2[%c0_5, %c0_6] : memref<1x768xf32, #tpu.memory_space<vmem>>, vector<1x768xf32>
    %16 = vector.broadcast %14 : vector<8x1xf32> to vector<8x768xf32>
    %17 = arith.mulf %6, %16 : vector<8x768xf32>
    %18 = vector.broadcast %15 : vector<1x768xf32> to vector<8x768xf32>
    %19 = arith.mulf %18, %17 : vector<8x768xf32>
    %c0_7 = arith.constant 0 : index
    %c0_8 = arith.constant 0 : index
    %20 = vector.load %arg3[%c0_7, %c0_8] : memref<1x768xf32, #tpu.memory_space<vmem>>, vector<1x768xf32>
    %21 = vector.broadcast %20 : vector<1x768xf32> to vector<8x768xf32>
    %22 = arith.addf %19, %21 : vector<8x768xf32>
    %c0_9 = arith.constant 0 : index
    %c0_10 = arith.constant 0 : index
    %23 = vector.load %arg4[%c0_9, %c0_10] : memref<8x768xf32, #tpu.memory_space<vmem>>, vector<8x768xf32>
    tpu.vector_store %arg4[%c0_9, %c0_10], %22 {strides = array<i32>} : memref<8x768xf32, #tpu.memory_space<vmem>>, vector<8x768xf32>,
    return
  }
  func.func @transform_0(%arg0: i32) -> (i32, i32) {
    %c0_i32 = arith.constant 0 : i32
    %c0_i32_0 = arith.constant 0 : i32
    return %arg0, %c0_i32 : i32, i32
  }
  func.func @transform_1(%arg0: i32) -> (i32, i32) {
    %c0_i32 = arith.constant 0 : i32
    %c0_i32_0 = arith.constant 0 : i32
    %c0_i32_1 = arith.constant 0 : i32
    return %c0_i32, %c0_i32_0 : i32, i32
  }
  func.func @transform_2(%arg0: i32) -> (i32, i32) {
    %c0_i32 = arith.constant 0 : i32
    %c0_i32_0 = arith.constant 0 : i32
    %c0_i32_1 = arith.constant 0 : i32
    return %c0_i32, %c0_i32_0 : i32, i32
  }
  func.func @transform_3(%arg0: i32) -> (i32, i32) {
    %c0_i32 = arith.constant 0 : i32
    %c0_i32_0 = arith.constant 0 : i32
    return %arg0, %c0_i32 : i32, i32
  }
}

</mosaic_0001>

<bundles_post_ra>
// kernel: tpu_custom_call.1
= control target key start
LH: loop header
LB: loop body
LE: loop exit
PB: predicated region body
PF: predicated region fallthrough
CT: control target
= control target key end

     0   :  { %8 = vsyncpa [#allocation3], 0  ;;  %s319_s0 = inlined_call_operand.hbm [shape: f32[8,768], index: 0, kind: input, shape index: {}]   ;;  %s320_s1 = inlined_call_operand.hbm [shape: f32[1,768], index: 1, kind: input, shape index: {}]   ;;  %s321_s2 = inlined_call_operand.hbm [shape: f32[1,768], index: 2, kind: input, shape index: {}]   ;;  %s322_s3 = inlined_call_operand.hbm [shape: f32[8,768], index: 3, kind: output, shape index: {}]  }
   0x1   :  { %9 = vsyncpa [#allocation6], 0 }
   0x2   :  { %10 = vsyncpa [#allocation4], 0  ;;  %s283_s12 = smov [#allocation5]   ;;  %s284_s14 = smov [#allocation2]  }
   0x3   :  { %s27_s13 = sshll.u32 %s283_s12, 4  ;;  %s17_s15 = sshll.u32 %s284_s14, 4  ;;  %s28_s13 = int_to_ptr.vmem [resolvable:$true] %s27_s13  ;;  %s18_s15 = int_to_ptr.vmem [resolvable:$true] %s17_s15 }
   0x4   :  { %s205_s16 = scalar_lea.vmem %s28_s13, 96  ;;  %p210_p1 = scmp.lt.s32.totalorder %s28_s13, %s28_s13 }
   0x5   :  { %p206_p0 = scmp.ne.s32.totalorder %s28_s13, %s205_s16  ;;  %p211_p2 = scmp.lt.s32.totalorder %s205_s16, %s205_s16 }
   0x7   :  { %p212_p3 = por %p211_p2, %p210_p1 }
   0x9   :  { %p213_p4 = pnand %p212_p3, %p206_p0 }
   0xb   :  { %216 = shalt.err (!%p213_p4)
}
   0xc   :  { %30 = dma.hbm_to_vmem [thread:$0]  %s320_s1, 96, %s28_s13, [#allocation6]  }
   0xd   :  { %s225_s19 = scalar_lea.vmem %s18_s15, 768  ;;  %p230_p6 = scmp.lt.s32.totalorder %s18_s15, %s18_s15 }
   0xe   :  { %p226_p5 = scmp.ne.s32.totalorder %s18_s15, %s225_s19  ;;  %p231_p7 = scmp.lt.s32.totalorder %s225_s19, %s225_s19 }
  0x10   :  { %p232_p8 = por %p231_p7, %p230_p6 }
  0x12   :  { %p233_p9 = pnand %p232_p8, %p226_p5 }
  0x14   :  { %236 = shalt.err (!%p233_p9)
}
  0x15   :  { %20 = dma.hbm_to_vmem [thread:$0]  %s319_s0, 768, %s18_s15, [#allocation3]  }
  0x16   :  { %s285_s22 = smov [#allocation7]  }
  0x17   :  { %s37_s23 = sshll.u32 %s285_s22, 4  ;;  %s38_s23 = int_to_ptr.vmem [resolvable:$true] %s37_s23 }
  0x18   :  { %s245_s24 = scalar_lea.vmem %s38_s23, 96  ;;  %p250_p11 = scmp.lt.s32.totalorder %s38_s23, %s38_s23 }
  0x19   :  { %p246_p10 = scmp.ne.s32.totalorder %s38_s23, %s245_s24  ;;  %p251_p12 = scmp.lt.s32.totalorder %s245_s24, %s245_s24 }
  0x1b   :  { %p252_p13 = por %p251_p12, %p250_p11 }
  0x1d   :  { %p253_p0 = pnand %p252_p13, %p246_p10 }
  0x1f   :  { %256 = shalt.err (!%p253_p0)
}
  0x20   :  { %40 = dma.hbm_to_vmem [thread:$0]  %s321_s2, 96, %s38_s23, [#allocation6]  }
  0x21   :  { %277 = dma.done.wait [#allocation3], 768  }
  0x22   :  { %278 = vsyncadd [#allocation3], 4294966528 }
  0x23   :  { %279 = dma.done.wait [#allocation6], 192  }
  0x24   :  { %280 = vsyncadd [#allocation6], 4294967104  ;;  %v50_v0 = vld [vmem:[#allocation2] sm:$0xff]  ;;  %v51_v1 = vld [vmem:[#allocation2 + $0x8] sm:$0xff]  ;;  %v95_v33 = vlaneseq  ;;  %s286_s0 = smov [#allocation8]  }
  0x25   :  { %v52_v2 = vld [vmem:[#allocation2 + $0x10] sm:$0xff]  ;;  %v56_v3 = vadd.f32 %v51_v1, %v50_v0  ;;  %v53_v4 = vld [vmem:[#allocation2 + $0x18] sm:$0xff]  ;;  %v54_v6 = vld [vmem:[#allocation2 + $0x20] sm:$0xff]  ;;  %s181_s2 = sshll.u32 %s286_s0, 4  ;;  %s182_s2 = int_to_ptr.vmem [resolvable:$true] %s181_s2 }
  0x26   :  { %v55_v8 = vld [vmem:[#allocation2 + $0x28] sm:$0xff]  ;;  %v96_v34 = vshrl.u32 %v95_v33, 7  ;;  %v87_v37 = vld [vmem:[#allocation5] sm:$0x3f]  ;;  %v131_v42 = vld [vmem:[#allocation7] sm:$0x3f]  ;;  %p262_p2 = scmp.lt.s32.totalorder %s182_s2, %s182_s2 }
  0x27   :  { %v57_v5 = vadd.f32 %v56_v3, %v52_v2  ;;  %s257_s26 = scalar_lea.vmem %s182_s2, 768 }
  0x28   :  { %v97_v35 = vsub.s32 0, %v96_v34  ;;  %v101_v36 = vsub.s32 1, %v96_v34  ;;  %v105_v38 = vsub.s32 2, %v96_v34  ;;  %v109_v39 = vsub.s32 3, %v96_v34  ;;  %p258_p1 = scmp.ne.s32.totalorder %s182_s2, %s257_s26  ;;  %p263_p3 = scmp.lt.s32.totalorder %s257_s26, %s257_s26 }
  0x29   :  { %v58_v7 = vadd.f32 %v57_v5, %v53_v4  ;;  %v113_v40 = vsub.s32 4, %v96_v34  ;;  %v117_v41 = vsub.s32 5, %v96_v34 }
  0x2a   :  { %v98_v43 = vrot.slane %v87_v37, %v97_v35  ;;  %v102_v44 = vrot.slane %v87_v37, %v101_v36  ;;  %v106_v45 = vrot.slane %v87_v37, %v105_v38  ;;  %v110_v46 = vrot.slane %v87_v37, %v109_v39  ;;  %p264_p4 = por %p263_p3, %p262_p2 }
  0x2b   :  { %v59_v9 = vadd.f32 %v58_v7, %v54_v6  ;;  %v114_v47 = vrot.slane %v87_v37, %v113_v40  ;;  %v118_v48 = vrot.slane %v87_v37, %v117_v41  ;;  %v136_v50 = vrot.slane %v131_v42, %v97_v35 }
  0x2c   :  { %v140_v51 = vrot.slane %v131_v42, %v101_v36  ;;  %v144_v52 = vrot.slane %v131_v42, %v105_v38  ;;  %v148_v53 = vrot.slane %v131_v42, %v109_v39  ;;  %v152_v60 = vrot.slane %v131_v42, %v113_v40  ;;  %p265_p5 = pnand %p264_p4, %p258_p1 }
  0x2d   :  { %v60_v10 = vadd.f32 %v59_v9, %v55_v8  ;;  %v156_v61 = vrot.slane %v131_v42, %v117_v41 }
  0x2f   :  { %61 = vadd.xlane.f32.xlu0 %v60_v10 }
  0xb8   :  { %v62_v11 = vpop.xlane.xlu0 %61 }
  0xb9   :  { %v64_v12 = vmul.f32 0.0013020834, %v62_v11 }
  0xbb   :  { %v65_v13 = vsub.f32 %v50_v0, %v64_v12  ;;  %v66_v14 = vsub.f32 %v51_v1, %v64_v12  ;;  %v67_v15 = vsub.f32 %v52_v2, %v64_v12  ;;  %v68_v16 = vsub.f32 %v53_v4, %v64_v12 }
  0xbc   :  { %v69_v19 = vsub.f32 %v54_v6, %v64_v12  ;;  %v70_v22 = vsub.f32 %v55_v8, %v64_v12 }
  0xbd   :  { %v71_v17 = vmul.f32 %v65_v13, %v65_v13  ;;  %v72_v18 = vmul.f32 %v66_v14, %v66_v14  ;;  %v73_v20 = vmul.f32 %v67_v15, %v67_v15  ;;  %v74_v23 = vmul.f32 %v68_v16, %v68_v16 }
  0xbe   :  { %v75_v25 = vmul.f32 %v69_v19, %v69_v19  ;;  %v76_v27 = vmul.f32 %v70_v22, %v70_v22 }
  0xbf   :  { %v77_v21 = vadd.f32 %v72_v18, %v71_v17 }
  0xc1   :  { %v78_v24 = vadd.f32 %v77_v21, %v73_v20 }
  0xc3   :  { %v79_v26 = vadd.f32 %v78_v24, %v74_v23 }
  0xc5   :  { %v80_v28 = vadd.f32 %v79_v26, %v75_v25 }
  0xc7   :  { %v81_v29 = vadd.f32 %v80_v28, %v76_v27 }
  0xc9   :  { %82 = vadd.xlane.f32.xlu0 %v81_v29 }
 0x152   :  { %v83_v30 = vpop.xlane.xlu0 %82 }
 0x153   :  { %v84_v31 = vmul.f32 0.0013020834, %v83_v30 }
 0x155   :  { %v85_v32 = vadd.f32 1e-05, %v84_v31 }
 0x157   :  { %195 = vrsqrt.f32 %v85_v32 }
 0x164   :  { %v196_v49 = vpop.eup %195 }
 0x165   :  { %v88_v54 = vmul.f32 %v196_v49, %v65_v13  ;;  %v89_v55 = vmul.f32 %v196_v49, %v66_v14  ;;  %v90_v56 = vmul.f32 %v196_v49, %v67_v15  ;;  %v91_v57 = vmul.f32 %v196_v49, %v68_v16 }
 0x166   :  { %v92_v58 = vmul.f32 %v196_v49, %v69_v19  ;;  %v93_v59 = vmul.f32 %v196_v49, %v70_v22 }
 0x167   :  { %v125_v62 = vmul.f32 %v98_v43, %v88_v54  ;;  %v126_v63 = vmul.f32 %v102_v44, %v89_v55  ;;  %v127_v0 = vmul.f32 %v106_v45, %v90_v56  ;;  %v128_v1 = vmul.f32 %v110_v46, %v91_v57 }
 0x168   :  { %v129_v2 = vmul.f32 %v114_v47, %v92_v58  ;;  %v130_v3 = vmul.f32 %v118_v48, %v93_v59 }
 0x169   :  { %v163_v4 = vadd.f32 %v136_v50, %v125_v62  ;;  %v164_v5 = vadd.f32 %v140_v51, %v126_v63  ;;  %v165_v6 = vadd.f32 %v144_v52, %v127_v0  ;;  %v166_v7 = vadd.f32 %v148_v53, %v128_v1 }
 0x16a   :  { %v167_v8 = vadd.f32 %v152_v60, %v129_v2  ;;  %v168_v9 = vadd.f32 %v156_v61, %v130_v3 }
 0x16b   :  { %169 = vst [vmem:[#allocation8] sm:$0xff] %v163_v4  ;;  %170 = vst [vmem:[#allocation8 + $0x8] sm:$0xff] %v164_v5 }
 0x16c   :  { %171 = vst [vmem:[#allocation8 + $0x10] sm:$0xff] %v165_v6  ;;  %172 = vst [vmem:[#allocation8 + $0x18] sm:$0xff] %v166_v7 }
 0x16d   :  { %173 = vst [vmem:[#allocation8 + $0x20] sm:$0xff] %v167_v8  ;;  %174 = vst [vmem:[#allocation8 + $0x28] sm:$0xff] %v168_v9 }
 0x16e   :  { %268 = shalt.err (!%p265_p5)
}
 0x16f   :  { %184 = dma.vmem_to_hbm [thread:$0]  %s182_s2, 768, %s322_s3, [#allocation4]  }
 0x170   :  { %281 = dma.done.wait [#allocation4], 768  }
 0x171   :  { %282 = vsyncadd [#allocation4], 4294966528 }
 0x172   :  { %188 = vsyncpa [#allocation3], 1 }
 0x173   :  { %189 = vsyncpa [#allocation6], 1 }
 0x174   :  { %190 = vsyncpa [#allocation4], 1 }

</bundles_post_ra>
